<compile_context>
chip_gen: v7x
topology: tpu7x:2x2x1
jax: 0.10.0
libtpu: 0.0.40
codegen_flags: <defaults>
</compile_context>

<pallas_src>
import math

import jax
import jax.numpy as jnp
from jax.experimental import pallas as pl
from jax.experimental.pallas import tpu as pltpu


def _round_up(v, m):
    return (v + m - 1) // m * m


def _transition_kernel(x_ref, scale_ref, bias_ref, w_ref, o_ref):
    """One grid step = one tile of tm pooled pixels.

    x_ref:     (tm, Kp)   bf16 input pixels; K = 4 pool positions * C (padded)
    scale_ref: (1, Kp)    bf16 folded BN scale (tiled 4x over pool positions)
    bias_ref:  (1, Kp)    bf16 folded BN bias
    w_ref:     (Kp, Cop)  bf16 1x1-conv weight stacked 4x, pre-scaled by 0.25
    o_ref:     (tm, Cop)  output tile (f32)
    """
    # Folded BN + ReLU in bf16.
    a = jnp.maximum(x_ref[...] * scale_ref[...] + bias_ref[...], 0.0)
    # conv1x1 + 2x2 avg-pool as one MXU matmul over K = 4*C (f32 accumulation;
    # weight already carries the 0.25 pool factor).
    o_ref[...] = jnp.dot(a, w_ref[...],
                         preferred_element_type=jnp.float32).astype(o_ref.dtype)


def _vmem_budget_bytes():
    """Per-chip VMEM budget (bytes) for the kernel working set + scoped limit."""
    try:
        phys = int(pltpu.get_tpu_info().vmem_capacity_bytes)
    except Exception:
        phys = 64 * 1024 * 1024          # conservative default (v7x-sized VMEM)
    # Leave ~25% headroom under physical, cap the scoped limit at 96 MiB.
    limit = min(phys * 3 // 4, 96 * 1024 * 1024)
    budget = limit - 4 * 1024 * 1024     # slack for compiler-internal scratch
    return budget, limit


def _pick_tm(M, Kp, Cop, out_bytes, budget):
    """Largest M-tile whose pipelined working set fits the VMEM budget."""
    resident = Kp * Cop * 2 + 2 * 2 * Kp            # weight + scale + bias (bf16, 1-buf)
    per_row = 2 * Kp * 2 + 2 * Cop * out_bytes      # x (bf16, 2-buf) + out (2-buf)
    tm = (budget - resident) // max(per_row, 1)
    tm = max(8, min(1024, (tm // 8) * 8))
    # Keep >= 2 grid steps when M allows so v7x's 2nd TensorCore gets work.
    tm = min(tm, max(8, _round_up(pl.cdiv(M, 2), 8)))
    return tm


def transition_forward(x_nchw, gamma, beta, run_mean, run_var, conv_w, eps=1e-5):
    """Transition.forward with drop_rate=0.0, eval-mode BatchNorm."""
    # TODO(synk): F.dropout (drop_rate > 0) and training-mode BN batch stats
    # are not implemented; module default drop_rate=0.0, eval-mode semantics.
    N, C, H, W = x_nchw.shape
    Cout = conv_w.shape[0]
    Ho, Wo = H // 2, W // 2            # floor, matches F.avg_pool2d(2) truncation
    M = N * Ho * Wo
    K = 4 * C

    # Fold eval-mode BN (running stats) into a per-channel scale + bias.
    scale = gamma / jnp.sqrt(run_var + eps)
    bias = beta - run_mean * scale

    # Glue: NCHW -> (M, 4*C) with a single fused cast+transpose materialization.
    # Per pooled pixel the K order is (dh, dw, c); M order is (n, ho, wo).
    x = x_nchw[:, :, :Ho * 2, :Wo * 2].astype(jnp.bfloat16)
    x = x.reshape(N, C, Ho, 2, Wo, 2)
    x = jnp.transpose(x, (0, 2, 4, 3, 5, 1)).reshape(M, K)

    # 1x1-conv weight -> (K, Cout): stacked 4x along K, pre-scaled by 1/4 so
    # the matmul directly produces the 2x2 average pool.
    w = jnp.tile(conv_w.reshape(Cout, C).T, (4, 1)) * 0.25
    scale4 = jnp.tile(scale, 4).astype(jnp.bfloat16)
    bias4 = jnp.tile(bias, 4).astype(jnp.bfloat16)

    # Lane-dense padding (applied only when actually needed).
    Kp = _round_up(K, 128)
    Cop = _round_up(Cout, 128)
    out_dtype = x_nchw.dtype
    out_bytes = jnp.dtype(out_dtype).itemsize

    budget, vmem_limit = _vmem_budget_bytes()
    tm = _pick_tm(M, Kp, Cop, out_bytes, budget)
    Mp = _round_up(M, tm)

    if Mp != M or Kp != K:
        x = jnp.pad(x, ((0, Mp - M), (0, Kp - K)))
    if Kp != K:
        scale4 = jnp.pad(scale4, (0, Kp - K))
        bias4 = jnp.pad(bias4, (0, Kp - K))
    scale4 = scale4.reshape(1, Kp)
    bias4 = bias4.reshape(1, Kp)
    if Kp != K or Cop != Cout:
        w = jnp.pad(w, ((0, Kp - K), (0, Cop - Cout)))
    w = w.astype(jnp.bfloat16)

    def _build(single_buffer_invariants):
        inv = ({'pipeline_mode': pl.Buffered(1)}
               if single_buffer_invariants else {})
        grid_spec = pltpu.PrefetchScalarGridSpec(
            num_scalar_prefetch=0,
            grid=(Mp // tm,),                          # pooled-pixel tiles
            in_specs=[
                pl.BlockSpec((tm, Kp), lambda i: (i, 0)),
                pl.BlockSpec((1, Kp), lambda i: (0, 0), **inv),
                pl.BlockSpec((1, Kp), lambda i: (0, 0), **inv),
                pl.BlockSpec((Kp, Cop), lambda i: (0, 0), **inv),
            ],
            out_specs=pl.BlockSpec((tm, Cop), lambda i: (i, 0)),
        )
        return pl.pallas_call(
            _transition_kernel,
            out_shape=jax.ShapeDtypeStruct((Mp, Cop), out_dtype),
            grid_spec=grid_spec,
            compiler_params=pltpu.CompilerParams(
                dimension_semantics=("parallel",),
                vmem_limit_bytes=vmem_limit),
        )

    try:
        # Loop-invariant operands (fetched once) single-buffered: avoids a
        # second VMEM copy of the (Kp, Cop) stacked weight.
        out = _build(True)(x, scale4, bias4, w)
    except Exception:
        # pipeline_mode not supported by this JAX version -> default buffering.
        out = _build(False)(x, scale4, bias4, w)

    # Glue: (Mp, Cop) -> (N, Cout, Ho, Wo)
    out = out[:M, :Cout].reshape(N, Ho, Wo, Cout)
    return jnp.transpose(out, (0, 3, 1, 2))


if __name__ == "__main__":
    key = jax.random.PRNGKey(0)
    k = jax.random.split(key, 6)

    N, C, H, W = 2, 8, 16, 16        # num_channels = 8
    Cout = 4                         # num_out_channels = 4

    x = jax.random.normal(k[0], (N, C, H, W), jnp.float32)
    gamma = 1.0 + 0.1 * jax.random.normal(k[1], (C,), jnp.float32)   # bn1.weight
    beta = 0.1 * jax.random.normal(k[2], (C,), jnp.float32)          # bn1.bias
    run_mean = 0.1 * jax.random.normal(k[3], (C,), jnp.float32)      # bn1.running_mean
    run_var = jax.random.uniform(k[4], (C,), jnp.float32, 0.5, 1.5)  # bn1.running_var
    conv_w = jax.random.normal(k[5], (Cout, C, 1, 1), jnp.float32) / math.sqrt(C)

    out = jax.block_until_ready(
        transition_forward(x, gamma, beta, run_mean, run_var, conv_w))

    # Pure-JAX f32 reference for the same (eval-mode) semantics.
    eps = 1e-5
    xn = (x - run_mean[None, :, None, None]) / jnp.sqrt(run_var + eps)[None, :, None, None]
    act = jnp.maximum(xn * gamma[None, :, None, None] + beta[None, :, None, None], 0.0)
    conv = jnp.einsum("nchw,oc->nohw", act, conv_w.reshape(Cout, C))
    ref = conv.reshape(N, Cout, H // 2, 2, W // 2, 2).mean(axis=(3, 5))

    assert out.shape == (N, Cout, H // 2, W // 2), out.shape
    # Tolerance accounts for bf16 activation stream / scale / weight
    # (matmul still accumulates in f32).
    assert jnp.allclose(out, ref, atol=2e-2, rtol=2e-2), float(jnp.max(jnp.abs(out - ref)))
    print("KERNEL_OK")
</pallas_src>

<mosaic_0001>
module attributes {stable_mosaic.version = 11 : i64} {
  func.func @_transition_kernel(%arg0: i32, %arg1: memref<64x128xbf16, #tpu.memory_space<vmem>>, %arg2: memref<1x128xbf16, #tpu.memory_space<vmem>>, %arg3: memref<1x128xbf16, #tpu.memory_space<vmem>>, %arg4: memref<128x128xbf16, #tpu.memory_space<vmem>>, %arg5: memref<64x128xf32, #tpu.memory_space<vmem>>) attributes {dimension_semantics = [#tpu.dimension_semantics<parallel>], iteration_bounds = array<i64: 2>, scalar_prefetch = 0 : i64, scratch_operands = 0 : i64, tpu.core_type = #tpu.core_type<tc>, window_params = [{transform_indices = @transform_0, window_bounds = array<i64: 64, 128>}, {pipeline_mode = #tpu.pipeline_mode<synchronous>, transform_indices = @transform_1, window_bounds = array<i64: 1, 128>}, {pipeline_mode = #tpu.pipeline_mode<synchronous>, transform_indices = @transform_2, window_bounds = array<i64: 1, 128>}, {pipeline_mode = #tpu.pipeline_mode<synchronous>, transform_indices = @transform_3, window_bounds = array<i64: 128, 128>}, {transform_indices = @transform_4, window_bounds = array<i64: 64, 128>}]} {
    %c0 = arith.constant 0 : index
    %c0_0 = arith.constant 0 : index
    %0 = vector.load %arg1[%c0, %c0_0] : memref<64x128xbf16, #tpu.memory_space<vmem>>, vector<64x128xbf16>
    %c0_1 = arith.constant 0 : index
    %c0_2 = arith.constant 0 : index
    %1 = vector.load %arg2[%c0_1, %c0_2] : memref<1x128xbf16, #tpu.memory_space<vmem>>, vector<1x128xbf16>
    %2 = vector.broadcast %1 : vector<1x128xbf16> to vector<64x128xbf16>
    %3 = arith.mulf %0, %2 : vector<64x128xbf16>
    %c0_3 = arith.constant 0 : index
    %c0_4 = arith.constant 0 : index
    %4 = vector.load %arg3[%c0_3, %c0_4] : memref<1x128xbf16, #tpu.memory_space<vmem>>, vector<1x128xbf16>
    %5 = vector.broadcast %4 : vector<1x128xbf16> to vector<64x128xbf16>
    %6 = arith.addf %3, %5 : vector<64x128xbf16>
    %cst = arith.constant 0.000000e+00 : bf16
    %7 = vector.broadcast %cst : bf16 to vector<64x128xbf16>
    %8 = arith.maximumf %6, %7 : vector<64x128xbf16>
    %c0_5 = arith.constant 0 : index
    %c0_6 = arith.constant 0 : index
    %9 = vector.load %arg4[%c0_5, %c0_6] : memref<128x128xbf16, #tpu.memory_space<vmem>>, vector<128x128xbf16>
    %cst_7 = arith.constant dense<0.000000e+00> : vector<64x128xf32>
    %10 = tpu.matmul %8, %9, %cst_7 {dimension_numbers = #tpu.dot_dimension_numbers<[1], [0], [0], [1], [0, 0, 1, 1], [], []>} : vector<64x128xbf16>, vector<128x128xbf16>, vector<64x128xf32> -> vector<64x128xf32>
    %c0_8 = arith.constant 0 : index
    %c0_9 = arith.constant 0 : index
    %11 = vector.load %arg5[%c0_8, %c0_9] : memref<64x128xf32, #tpu.memory_space<vmem>>, vector<64x128xf32>
    tpu.vector_store %arg5[%c0_8, %c0_9], %10 {strides = array<i32>} : memref<64x128xf32, #tpu.memory_space<vmem>>, vector<64x128xf32>,
    return
  }
  func.func @transform_0(%arg0: i32) -> (i32, i32) {
    %c0_i32 = arith.constant 0 : i32
    %c0_i32_0 = arith.constant 0 : i32
    return %arg0, %c0_i32 : i32, i32
  }
  func.func @transform_1(%arg0: i32) -> (i32, i32) {
    %c0_i32 = arith.constant 0 : i32
    %c0_i32_0 = arith.constant 0 : i32
    %c0_i32_1 = arith.constant 0 : i32
    return %c0_i32, %c0_i32_0 : i32, i32
  }
  func.func @transform_2(%arg0: i32) -> (i32, i32) {
    %c0_i32 = arith.constant 0 : i32
    %c0_i32_0 = arith.constant 0 : i32
    %c0_i32_1 = arith.constant 0 : i32
    return %c0_i32, %c0_i32_0 : i32, i32
  }
  func.func @transform_3(%arg0: i32) -> (i32, i32) {
    %c0_i32 = arith.constant 0 : i32
    %c0_i32_0 = arith.constant 0 : i32
    %c0_i32_1 = arith.constant 0 : i32
    return %c0_i32, %c0_i32_0 : i32, i32
  }
  func.func @transform_4(%arg0: i32) -> (i32, i32) {
    %c0_i32 = arith.constant 0 : i32
    %c0_i32_0 = arith.constant 0 : i32
    return %arg0, %c0_i32 : i32, i32
  }
}

module attributes {stable_mosaic.version = 11 : i64} {
  func.func @_transition_kernel(%arg0: i32, %arg1: memref<64x128xbf16, #tpu.memory_space<vmem>>, %arg2: memref<1x128xbf16, #tpu.memory_space<vmem>>, %arg3: memref<1x128xbf16, #tpu.memory_space<vmem>>, %arg4: memref<128x128xbf16, #tpu.memory_space<vmem>>, %arg5: memref<64x128xf32, #tpu.memory_space<vmem>>) attributes {dimension_semantics = [#tpu.dimension_semantics<parallel>], iteration_bounds = array<i64: 2>, scalar_prefetch = 0 : i64, scratch_operands = 0 : i64, tpu.core_type = #tpu.core_type<tc>, window_params = [{transform_indices = @transform_0, window_bounds = array<i64: 64, 128>}, {pipeline_mode = #tpu.pipeline_mode<synchronous>, transform_indices = @transform_1, window_bounds = array<i64: 1, 128>}, {pipeline_mode = #tpu.pipeline_mode<synchronous>, transform_indices = @transform_2, window_bounds = array<i64: 1, 128>}, {pipeline_mode = #tpu.pipeline_mode<synchronous>, transform_indices = @transform_3, window_bounds = array<i64: 128, 128>}, {transform_indices = @transform_4, window_bounds = array<i64: 64, 128>}]} {
    %c0 = arith.constant 0 : index
    %c0_0 = arith.constant 0 : index
    %0 = vector.load %arg1[%c0, %c0_0] : memref<64x128xbf16, #tpu.memory_space<vmem>>, vector<64x128xbf16>
    %c0_1 = arith.constant 0 : index
    %c0_2 = arith.constant 0 : index
    %1 = vector.load %arg2[%c0_1, %c0_2] : memref<1x128xbf16, #tpu.memory_space<vmem>>, vector<1x128xbf16>
    %2 = vector.broadcast %1 : vector<1x128xbf16> to vector<64x128xbf16>
    %3 = arith.mulf %0, %2 : vector<64x128xbf16>
    %c0_3 = arith.constant 0 : index
    %c0_4 = arith.constant 0 : index
    %4 = vector.load %arg3[%c0_3, %c0_4] : memref<1x128xbf16, #tpu.memory_space<vmem>>, vector<1x128xbf16>
    %5 = vector.broadcast %4 : vector<1x128xbf16> to vector<64x128xbf16>
    %6 = arith.addf %3, %5 : vector<64x128xbf16>
    %cst = arith.constant 0.000000e+00 : bf16
    %7 = vector.broadcast %cst : bf16 to vector<64x128xbf16>
    %8 = arith.maximumf %6, %7 : vector<64x128xbf16>
    %c0_5 = arith.constant 0 : index
    %c0_6 = arith.constant 0 : index
    %9 = vector.load %arg4[%c0_5, %c0_6] : memref<128x128xbf16, #tpu.memory_space<vmem>>, vector<128x128xbf16>
    %cst_7 = arith.constant dense<0.000000e+00> : vector<64x128xf32>
    %10 = tpu.matmul %8, %9, %cst_7 {dimension_numbers = #tpu.dot_dimension_numbers<[1], [0], [0], [1], [0, 0, 1, 1], [], []>} : vector<64x128xbf16>, vector<128x128xbf16>, vector<64x128xf32> -> vector<64x128xf32>
    %c0_8 = arith.constant 0 : index
    %c0_9 = arith.constant 0 : index
    %11 = vector.load %arg5[%c0_8, %c0_9] : memref<64x128xf32, #tpu.memory_space<vmem>>, vector<64x128xf32>
    tpu.vector_store %arg5[%c0_8, %c0_9], %10 {strides = array<i32>} : memref<64x128xf32, #tpu.memory_space<vmem>>, vector<64x128xf32>,
    return
  }
  func.func @transform_0(%arg0: i32) -> (i32, i32) {
    %c0_i32 = arith.constant 0 : i32
    %c0_i32_0 = arith.constant 0 : i32
    return %arg0, %c0_i32 : i32, i32
  }
  func.func @transform_1(%arg0: i32) -> (i32, i32) {
    %c0_i32 = arith.constant 0 : i32
    %c0_i32_0 = arith.constant 0 : i32
    %c0_i32_1 = arith.constant 0 : i32
    return %c0_i32, %c0_i32_0 : i32, i32
  }
  func.func @transform_2(%arg0: i32) -> (i32, i32) {
    %c0_i32 = arith.constant 0 : i32
    %c0_i32_0 = arith.constant 0 : i32
    %c0_i32_1 = arith.constant 0 : i32
    return %c0_i32, %c0_i32_0 : i32, i32
  }
  func.func @transform_3(%arg0: i32) -> (i32, i32) {
    %c0_i32 = arith.constant 0 : i32
    %c0_i32_0 = arith.constant 0 : i32
    %c0_i32_1 = arith.constant 0 : i32
    return %c0_i32, %c0_i32_0 : i32, i32
  }
  func.func @transform_4(%arg0: i32) -> (i32, i32) {
    %c0_i32 = arith.constant 0 : i32
    %c0_i32_0 = arith.constant 0 : i32
    return %arg0, %c0_i32 : i32, i32
  }
}

</mosaic_0001>

<bundles_post_ra>
// kernel: tpu_custom_call.1
= control target key start
LH: loop header
LB: loop body
LE: loop exit
PB: predicated region body
PF: predicated region fallthrough
CT: control target
= control target key end

     0   :  { %9 = vsyncpa [#allocation3], 0  ;;  %s1089_s0 = inlined_call_operand.hbm [shape: bf16[128,128], index: 0, kind: input, shape index: {}]   ;;  %s1090_s1 = inlined_call_operand.vmem [shape: bf16[1,128], index: 1, kind: input, shape index: {}]   ;;  %s1091_s2 = inlined_call_operand.vmem [shape: bf16[1,128], index: 2, kind: input, shape index: {}]   ;;  %s1092_s3 = inlined_call_operand.hbm [shape: bf16[128,128], index: 3, kind: input, shape index: {}]   ;;  %s1093_s4 = inlined_call_operand.hbm [shape: f32[128,128], index: 4, kind: output, shape index: {}]  }
   0x1   :  { %11 = vsyncpa [#allocation3 + $0x1], 0 }
   0x2   :  { %12 = vsyncpa [#allocation6], 0 }
   0x3   :  { %13 = vsyncpa [#allocation4], 0 }
   0x4   :  { %15 = vsyncpa [#allocation4 + $0x1], 0  ;;  %s865_s15 = smov 0   ;;  %s867_s16 = smov 0  }
   0x5   :  { %s869_s17 = smov 0   ;;  %s871_s18 = smov 0  }
   0x6 LB: > { %s886_s19 = sadd.s32 4294967295, %s830_s18   ;;  %s548_s20 = sadd.s32 4294967294, %s830_s18   ;;  %s830_s18 = sphi %s871_s18, %s1113_s18   ;;  %s826_s17 = sphi %s869_s17, %s1112_s17   ;;  %s822_s16 = sphi %s867_s16, %s1111_s16   ;;  %s818_s15 = sphi %s865_s15, %s1110_s15  }
   0x7   : > { %p41_p0 = scmp.ne.s32.totalorder %s822_s16, %s818_s15  ;;  %p1094_p1 = scmp.eq.s32.totalorder %s886_s19, 0 }
   0x8   : > { %p134_p3 = scmp.eq.s32.totalorder %s548_s20, 1  ;;  %p549_p5 = scmp.ge.s32.totalorder %s830_s18, 1 }
   0x9   : > { %p895_p4 = por %p1094_p1, %p41_p0  ;;  %p141_p7 = scmp.lt.s32.totalorder %s830_s18, 3 }
   0xa   : > { %p900_p6 = por %p134_p3, %p41_p0  ;;  %s832_s24 = smov [#allocation5]  }
   0xb   : > { %s1097_s21 = scalar_select %p895_p4, 1, 0 }
   0xc   : > { %s1098_s22 = scalar_select %p900_p6, 1, 0 }
   0xd   : > { %p905_p8 = pnand %p549_p5, %p141_p7  ;;  %s159_s25 = sshll.u32 %s832_s24, 4  ;;  %s909_s25 = int_to_ptr.vmem [resolvable:$true] %s159_s25 }
   0xe   : > { %s921_s27 = sadd.s32 1, %s830_s18   ;;  %s28_s28 = sadd.s32 1, %s826_s17 }
   0xf   : > { %s1099_s23 = scalar_select %p905_p8, 1, 0 }
  0x10   : > { %p640_p9 = pneg %p905_p8  ;;  %s25_s29 = ssub.s32 %s830_s18, %s921_s27 }
  0x11   : > { %s702_s6 = scalar_lea.hbm %s1092_s3, 1024 }
  0x12   : > { %p916_p11 = pnand %p640_p9, %p1094_p1  ;;  %p703_p12 = scmp.ne.s32.totalorder %s1092_s3, %s702_s6 }
  0x13   : > { %p709_p5 = scmp.lt.u32.totalorder %s702_s6, %s1092_s3 }
  0x14   : > { %p704_p13 = pneg %p916_p11 }
  0x16   : > { %p705_p0 = pnand %p704_p13, %p703_p12 }
  0x18   : > { %p706_p3 = pneg %p705_p0 }
  0x1a   : > { %p711_p7 = pnand %p709_p5, %p706_p3 }
  0x1c   : > { %714 = shalt.err (!%p711_p7)
}
  0x1d   : > { %s715_s11 = scalar_lea.vmem %s909_s25, 1024  ;;  %p723_p2 = scmp.lt.s32.totalorder %s909_s25, %s909_s25 }
  0x1e   : > { %p716_p9 = scmp.ne.s32.totalorder %s909_s25, %s715_s11  ;;  %p724_p6 = scmp.lt.s32.totalorder %s715_s11, %s715_s11 }
  0x20   : > { %p718_p10 = pnand %p716_p9, %p704_p13  ;;  %p725_p4 = por %p724_p6, %p723_p2 }
  0x22   : > { %p719_p1 = pneg %p718_p10 }
  0x24   : > { %p726_p8 = pnand %p725_p4, %p719_p1 }
  0x26   : > { %729 = shalt.err (!%p726_p8)
}
  0x27   : > { %s833_s12 = smov 64   ;;  %s834_s13 = smov 4  }
  0x28   : > { %643 = dma.hbm_to_vmem [thread:$0]  (!%p916_p11), %s1092_s3, 1024, %s909_s25, [#allocation6], %s833_s12, %s833_s12, %s834_s13  }
  0x29   : > { %p26_p1 = scmp.eq.s32.totalorder %s25_s29, 0  ;;  %p35_p2 = scmp.ne.s32.totalorder %s826_s17, %s822_s16 }
  0x2a   : > { %p36_p4 = scmp.eq.s32.totalorder %s830_s18, 0  ;;  %p653_p6 = scmp.lt.s32.totalorder %s830_s18, 2 }
  0x2b   : > { %s955_s24 = scalar_select %p26_p1, %s826_s17, %s28_s28  }
  0x2c   : > { %p37_p8 = por %p36_p4, %p35_p2  ;;  %p1101_p10 = scmp.eq.s32.totalorder %s886_s19, 1 }
  0x2d   : > { %s173_s26 = sand.u32 1, %s826_s17   ;;  %s578_s5 = sshll.u32 %s830_s18, 9 }
  0x2e   : > { %p959_p12 = por %p1101_p10, %p35_p2  ;;  %s552_s6 = sshll.u32 %s173_s26, 5 }
  0x2f   : > { %s968_s9 = scalar_lea.hbm %s1089_s0, %s578_s5  ;;  %s177_s25 = scalar_lea.vmem [#allocation2], %s552_s6 }
  0x30   : > { %s184_s28 = sshll.u32 %s177_s25, 4  ;;  %p970_p11 = pnand %p653_p6, %p37_p8  ;;  %s974_s28 = int_to_ptr.vmem [resolvable:$true] %s184_s28 }
  0x31   : > { %s976_s10 = scalar_lea.sflag [#allocation3], %s173_s26  ;;  %s730_s11 = scalar_lea.hbm %s968_s9, 512 }
  0x32   : > { %p731_p13 = scmp.ne.s32.totalorder %s968_s9, %s730_s11  ;;  %p732_p0 = pneg %p970_p11 }
  0x33   : > { %s735_s5 = scalar_lea.hbm %s1089_s0, 1024  ;;  %p736_p7 = scmp.lt.u32.totalorder %s968_s9, %s1089_s0 }
  0x34   : > { %p733_p3 = pnand %p732_p0, %p731_p13  ;;  %p737_p9 = scmp.lt.u32.totalorder %s735_s5, %s730_s11 }
  0x35   : > { %p739_p2 = scmp.lt.u32.totalorder %s730_s11, %s968_s9 }
  0x36   : > { %p734_p5 = pneg %p733_p3  ;;  %p738_p1 = por %p737_p9, %p736_p7 }
  0x38   : > { %p740_p4 = por %p739_p2, %p738_p1 }
  0x3a   : > { %p741_p6 = pnand %p740_p4, %p734_p5 }
  0x3c   : > { %744 = shalt.err (!%p741_p6)
}
  0x3d   : > { %s745_s26 = scalar_lea.vmem %s974_s28, 512  ;;  %s835_s8 = smov [#allocation2]  }
  0x3e   : > { %p746_p8 = scmp.ne.s32.totalorder %s974_s28, %s745_s26  ;;  %s750_s25 = sshll.u32 %s835_s8, 4  ;;  %s751_s25 = int_to_ptr.vmem [resolvable:$false] %s750_s25 }
  0x3f   : > { %s752_s14 = scalar_lea.vmem %s751_s25, 1024  ;;  %p753_p3 = scmp.lt.s32.totalorder %s974_s28, %s751_s25 }
  0x40   : > { %p748_p10 = pnand %p746_p8, %p732_p0  ;;  %p754_p7 = scmp.lt.s32.totalorder %s752_s14, %s745_s26 }
  0x42   : > { %p749_p13 = pneg %p748_p10  ;;  %p755_p9 = por %p754_p7, %p753_p3 }
  0x44   : > { %p756_p1 = pnand %p755_p9, %p749_p13 }
  0x46   : > { %759 = shalt.err (!%p756_p1)
}
  0x47   : > { %647 = dma.hbm_to_vmem [thread:$0]  (!%p970_p11), %s968_s9, 512, %s974_s28, %s976_s10, %s833_s12, %s833_s12, %s834_s13  }
  0x48   : > { %p1104_p0 = scmp.ne.s32.totalorder %s1099_s23, 0 }
  0x49   : > { %s1010_s11 = sand.u32 (!%p1104_p0), 1, %s822_s16   ;;  %p1105_p5 = scmp.ne.s32.totalorder (!%p1104_p0), %s1097_s21, 0 }
  0x4a   : > { %196 = sbr.rel (%p1104_p0) target bundleno = 348 (0x15c), region = 36  ;;  %s556_s20 = sshll.u32 (!%p1104_p0), %s1010_s11, 5 }
  0x4b   : > { %s199_s5 = scalar_lea.sflag (!%p1104_p0), [#allocation3], %s1010_s11  ;;  %s1014_s6 = scalar_lea.vmem (!%p1104_p0), [#allocation2], %s556_s20 }
  0x51   : > { %805 = dma.done.wait (%p1105_p5), %s199_s5, 512  }
  0x52   : > { %807 = vsyncadd (%p1105_p5), %s199_s5, 4294966784  ;;  %p1106_p11 = scmp.eq.s32.totalorder %s886_s19, 0 }
  0x54   : > { %809 = dma.done.wait (%p1106_p11), [#allocation6], 1024   ;;  %p1107_p2 = pmov %p1106_p11 }
  0x55   : > { %v246_v0 = vlaneseq  ;;  %v694_v1 = vld [vmem:[#allocation5] sm:$0xff]   ;;  %v695_v2 = vld [vmem:[#allocation5 + $0x8] sm:$0xff]   ;;  %v696_v4 = vld [vmem:[#allocation5 + $0x10] sm:$0xff]   ;;  %v836_v37 = vmov 0   ;;  %s558_s9 = sshll.u32 %s1010_s11, 6  ;;  %s579_s10 = sshll.u32 %s886_s19, 10 }
  0x56   : > { %811 = vsyncadd (%p1107_p2), [#allocation6], 4294966272  ;;  %592 = vmatprep.subr.bf16.mxu0 %v694_v1  ;;  %616 = vmatprep.subr.bf16.mxu1 %v694_v1  ;;  %v697_v6 = vld [vmem:[#allocation5 + $0x18] sm:$0xff]   ;;  %v242_v7 = vld [vmem:[%s1090_s1] sm:$0x1]  ;;  %s230_s28 = scalar_lea.vmem [#allocation7], %s558_s9  ;;  %s1045_s8 = scalar_lea.hbm %s1093_s4, %s579_s10 }
  0x57   : > { %593 = vmatpush3.bf16.msra.mxu0 %v694_v1  ;;  %624 = vmatpush3.bf16.msra.mxu1 %v694_v1  ;;  %v247_v3 = vshrl.u32 %v246_v0, 7  ;;  %v244_v8 = vpack.i.b16 %v242_v7, %v242_v7  ;;  %v262_v9 = vld [vmem:[%s1091_s2] sm:$0x1]  ;;  %v235_v14 = vld [vmem:[%s1014_s6 + $0x4] sm:$0xf]  ;;  %v699_v27 = vld [vmem:[#allocation5 + $0x28] sm:$0xff]  }
  0x58   : > { %594 = vmatprep.subr.bf16.mxu0 %v695_v2  ;;  %617 = vmatprep.subr.bf16.mxu1 %v695_v2  ;;  %v264_v10 = vpack.i.b16 %v262_v9, %v262_v9  ;;  %v698_v11 = vld [vmem:[#allocation5 + $0x20] sm:$0xff]   ;;  %v238_v16 = vld [vmem:[%s1014_s6 + $0x10] sm:$0xf]  ;;  %v239_v18 = vld [vmem:[%s1014_s6 + $0x14] sm:$0xf]  ;;  %s465_s29 = sshll.u32 %s230_s28, 4  ;;  %s1040_s29 = int_to_ptr.vmem [resolvable:$true] %s465_s29 }
  0x59   : > { %v248_v5 = vsub.s32 0, %v247_v3  ;;  %v234_v13 = vld [vmem:[%s1014_s6] sm:$0xf]  ;;  %v236_v20 = vld [vmem:[%s1014_s6 + $0x8] sm:$0xf]  ;;  %v700_v41 = vld [vmem:[#allocation5 + $0x30] sm:$0xff]  }
  0x5a   : > { %v237_v24 = vld [vmem:[%s1014_s6 + $0xc] sm:$0xf]  ;;  %v240_v25 = vld [vmem:[%s1014_s6 + $0x18] sm:$0xf]  ;;  %v241_v26 = vld [vmem:[%s1014_s6 + $0x1c] sm:$0xf] }
  0x5b   : > { %595 = vmatpush3.bf16.msra.mxu0 %v695_v2  ;;  %625 = vmatpush3.bf16.msra.mxu1 %v695_v2  ;;  %v249_v12 = vrot.slane %v244_v8, %v248_v5  ;;  %v269_v15 = vrot.slane %v264_v10, %v248_v5  ;;  %v701_v49 = vld [vmem:[#allocation5 + $0x38] sm:$0xff]   ;;  %s452_s19 = scalar_lea.sflag [#allocation4], %s1010_s11  ;;  %s760_s25 = scalar_lea.vmem %s1040_s29, 1024 }
  0x5c   : > { %596 = vmatprep.subr.bf16.mxu0 %v696_v4  ;;  %618 = vmatprep.subr.bf16.mxu1 %v696_v4  ;;  %p761_p4 = scmp.ne.s32.totalorder %s1040_s29, %s760_s25  ;;  %s837_s14 = smov [#allocation7]  }
  0x5d   : > { %v559_v17 = vcombine.low %v249_v12, %v249_v12  ;;  %v560_v19 = vcombine.low %v269_v15, %v269_v15  ;;  %s764_s20 = sshll.u32 %s837_s14, 4  ;;  %s765_s20 = int_to_ptr.vmem [resolvable:$false] %s764_s20 }
  0x5e   : > { %p762_p6 = pnand %p761_p4, %p959_p12  ;;  %s766_s5 = scalar_lea.vmem %s765_s20, 2048 }
  0x5f   : > { %597 = vmatpush3.bf16.msra.mxu0 %v696_v4  ;;  %626 = vmatpush3.bf16.msra.mxu1 %v696_v4  ;;  %v254_v21 = vmul.bf16 %v559_v17, %v234_v13  ;;  %v255_v22 = vmul.bf16 %v559_v17, %v235_v14  ;;  %v258_v23 = vmul.bf16 %v559_v17, %v238_v16  ;;  %p767_p10 = scmp.lt.s32.totalorder %s1040_s29, %s765_s20  ;;  %p768_p13 = scmp.lt.s32.totalorder %s766_s5, %s760_s25 }
  0x60   : > { %598 = vmatprep.subr.bf16.mxu0 %v697_v6  ;;  %619 = vmatprep.subr.bf16.mxu1 %v697_v6  ;;  %v259_v28 = vmul.bf16 %v559_v17, %v239_v18  ;;  %v256_v32 = vmul.bf16 %v559_v17, %v236_v20  ;;  %v257_v34 = vmul.bf16 %v559_v17, %v237_v24  ;;  %p763_p8 = pneg %p762_p6 }
  0x61   : > { %v274_v29 = vadd.bf16 %v560_v19, %v254_v21  ;;  %v275_v30 = vadd.bf16 %v560_v19, %v255_v22  ;;  %v278_v31 = vadd.bf16 %v560_v19, %v258_v23  ;;  %v260_v35 = vmul.bf16 %v559_v17, %v240_v25  ;;  %p769_p3 = por %p768_p13, %p767_p10 }
  0x62   : > { %v279_v33 = vadd.bf16 %v560_v19, %v259_v28  ;;  %v261_v36 = vmul.bf16 %v559_v17, %v241_v26  ;;  %v276_v44 = vadd.bf16 %v560_v19, %v256_v32  ;;  %v277_v46 = vadd.bf16 %v560_v19, %v257_v34 }
  0x63   : > { %599 = vmatpush3.bf16.msra.mxu0 %v697_v6  ;;  %627 = vmatpush3.bf16.msra.mxu1 %v697_v6  ;;  %v282_v38 = vmax.bf16 %v836_v37, %v274_v29  ;;  %v283_v39 = vmax.bf16 %v836_v37, %v275_v30  ;;  %v286_v40 = vmax.bf16 %v836_v37, %v278_v31  ;;  %p770_p7 = pnand %p769_p3, %p763_p8 }
  0x64   : > { %600 = vmatprep.subr.bf16.mxu0 %v698_v11  ;;  %620 = vmatprep.subr.bf16.mxu1 %v698_v11  ;;  %v287_v42 = vmax.bf16 %v836_v37, %v279_v33  ;;  %v280_v47 = vadd.bf16 %v560_v19, %v260_v35  ;;  %v281_v48 = vadd.bf16 %v560_v19, %v261_v36 }
  0x65   : > { %v561_v43 = vcombine.low %v282_v38, %v283_v39  ;;  %v284_v50 = vmax.bf16 %v836_v37, %v276_v44  ;;  %v285_v51 = vmax.bf16 %v836_v37, %v277_v46 }
  0x66   : > { %v563_v45 = vcombine.low %v286_v40, %v287_v42  ;;  %v288_v52 = vmax.bf16 %v836_v37, %v280_v47  ;;  %v289_v53 = vmax.bf16 %v836_v37, %v281_v48 }
  0x67   : > { %601 = vmatpush3.bf16.msra.mxu0 %v698_v11  ;;  %628 = vmatpush3.bf16.msra.mxu1 %v698_v11  ;;  %v562_v54 = vcombine.low %v284_v50, %v285_v51 }
  0x68   : > { %602 = vmatprep.subr.bf16.mxu0 %v699_v27  ;;  %621 = vmatprep.subr.bf16.mxu1 %v699_v27  ;;  %v564_v55 = vcombine.low %v288_v52, %v289_v53 }
  0x69   : > { %608 = vmatprep.mubr.bf16.mxu0 %v561_v43  ;;  %612 = vmatprep.mubr.bf16.mxu1 %v563_v45 }
  0x6b   : > { %603 = vmatpush3.bf16.msra.mxu0 %v699_v27  ;;  %629 = vmatpush3.bf16.msra.mxu1 %v699_v27 }
  0x6c   : > { %604 = vmatprep.subr.bf16.mxu0 %v700_v41  ;;  %622 = vmatprep.subr.bf16.mxu1 %v700_v41 }
  0x6f   : > { %605 = vmatpush3.bf16.msra.mxu0 %v700_v41  ;;  %630 = vmatpush3.bf16.msra.mxu1 %v700_v41 }
  0x70   : > { %606 = vmatprep.subr.bf16.mxu0 %v701_v49  ;;  %623 = vmatprep.subr.bf16.mxu1 %v701_v49 }
  0x73   : > { %607 = vmatpush3.bf16.msra.mxu0 %v701_v49  ;;  %631 = vmatpush3.bf16.msra.mxu1 %v701_v49 }
  0x76   : > { %609 = vmatmul.mubr.bf16.vlgmr.msra.gmra.mrb[0].mxu0 %v562_v54  ;;  %613 = vmatmul.mubr.bf16.vlgmr.msra.gmra.mrb[0].mxu1 %v564_v55 }
 0x149   : > { %v610_v56 = vpop.f32.mrb[0].mxu0  ;;  %v614_v57 = vpop.f32.mrb[0].mxu1 }
 0x14a   : > { %445 = vst [vmem:[%s230_s28 + $0x10] sm:$0xff] %v610_v56  ;;  %449 = vst [vmem:[%s230_s28 + $0x30] sm:$0xff] %v614_v57  ;;  %v412_v58 = vpop.f32.mrb[1].mxu0  ;;  %v428_v59 = vpop.f32.mrb[1].mxu1 }
 0x14b   : > { %443 = vst [vmem:[%s230_s28] sm:$0xff] %v412_v58  ;;  %447 = vst [vmem:[%s230_s28 + $0x20] sm:$0xff] %v428_v59  ;;  %v611_v60 = vpop.f32.mrb[2].mxu0  ;;  %v615_v61 = vpop.f32.mrb[2].mxu1 }
 0x14c   : > { %446 = vst [vmem:[%s230_s28 + $0x18] sm:$0xff] %v611_v60  ;;  %450 = vst [vmem:[%s230_s28 + $0x38] sm:$0xff] %v615_v61  ;;  %v415_v62 = vpop.f32.mrb[3].mxu0  ;;  %v431_v63 = vpop.f32.mrb[3].mxu1 }
 0x14d   : > { %444 = vst [vmem:[%s230_s28 + $0x8] sm:$0xff] %v415_v62  ;;  %448 = vst [vmem:[%s230_s28 + $0x28] sm:$0xff] %v431_v63 }
 0x14e   : > { %773 = shalt.err (!%p770_p7)
}
 0x14f   : > { %s774_s6 = scalar_lea.hbm %s1045_s8, 1024  ;;  %s778_s12 = scalar_lea.hbm %s1093_s4, 2048 }
 0x150   : > { %p775_p9 = scmp.ne.s32.totalorder %s1045_s8, %s774_s6  ;;  %p779_p5 = scmp.lt.u32.totalorder %s1045_s8, %s1093_s4 }
 0x151   : > { %p780_p11 = scmp.lt.u32.totalorder %s778_s12, %s774_s6  ;;  %p782_p4 = scmp.lt.u32.totalorder %s774_s6, %s1045_s8 }
 0x152   : > { %p776_p1 = pnand %p775_p9, %p959_p12 }
 0x153   : > { %p781_p2 = por %p780_p11, %p779_p5 }
 0x154   : > { %p777_p0 = pneg %p776_p1 }
 0x155   : > { %p783_p6 = por %p782_p4, %p781_p2 }
 0x157   : > { %p784_p8 = pnand %p783_p6, %p777_p0 }
 0x159   : > { %787 = shalt.err (!%p784_p8)
}
 0x15a   : > { %s838_s28 = smov 128   ;;  %s839_s10 = smov 8  }
 0x15b   : > { %638 = dma.vmem_to_hbm [thread:$0]  (%p959_p12), %s1040_s29, 1024, %s1045_s8, %s452_s19, %s838_s28, %s838_s28, %s839_s10  }
 0x15c PF: > { %s480_s7 = sand.u32 1, %s818_s15   ;;  %p1108_p10 = scmp.ne.s32.totalorder %s1098_s22, 0 }
 0x15d   : > { %p1109_p13 = scmp.ge.s32.totalorder %s830_s18, 2  ;;  %s481_s26 = scalar_lea.sflag [#allocation4], %s480_s7 }
 0x15f   : > { %p649_p3 = pnand %p1109_p13, %p1108_p10 }
 0x161   : > { %813 = dma.done.wait (!%p649_p3), %s481_s26, 1024  }
 0x162   : > { %815 = vsyncadd (!%p649_p3), %s481_s26, 4294966272  ;;  %p18_p7 = scmp.ge.s32.totalorder %s921_s27, 4   ;;  %s1110_s15 = smov %s822_s16 }
 0x163   : > { %s1111_s16 = smov %s826_s17  ;;  %s1112_s17 = smov %s955_s24 }
 0x164   : > { %s1113_s18 = smov %s921_s27  ;;  %20 = sbr.rel (!%p18_p7) target bundleno = 6 (0x6), region = 85 }
 0x16b   :  { %486 = vsyncpa [#allocation3], 1 }
 0x16c   :  { %488 = vsyncpa [#allocation3 + $0x1], 1 }
 0x16d   :  { %489 = vsyncpa [#allocation6], 1 }
 0x16e   :  { %490 = vsyncpa [#allocation4], 1 }
 0x16f   :  { %492 = vsyncpa [#allocation4 + $0x1], 1 }

// kernel: tpu_custom_call.1
= control target key start
LH: loop header
LB: loop body
LE: loop exit
PB: predicated region body
PF: predicated region fallthrough
CT: control target
= control target key end

     0   :  { %9 = vsyncpa [#allocation3], 0  ;;  %s1089_s0 = inlined_call_operand.hbm [shape: bf16[128,128], index: 0, kind: input, shape index: {}]   ;;  %s1090_s1 = inlined_call_operand.vmem [shape: bf16[1,128], index: 1, kind: input, shape index: {}]   ;;  %s1091_s2 = inlined_call_operand.vmem [shape: bf16[1,128], index: 2, kind: input, shape index: {}]   ;;  %s1092_s3 = inlined_call_operand.hbm [shape: bf16[128,128], index: 3, kind: input, shape index: {}]   ;;  %s1093_s4 = inlined_call_operand.hbm [shape: f32[128,128], index: 4, kind: output, shape index: {}]  }
   0x1   :  { %11 = vsyncpa [#allocation3 + $0x1], 0 }
   0x2   :  { %12 = vsyncpa [#allocation6], 0 }
   0x3   :  { %13 = vsyncpa [#allocation4], 0 }
   0x4   :  { %15 = vsyncpa [#allocation4 + $0x1], 0  ;;  %s865_s15 = smov 0   ;;  %s867_s16 = smov 0  }
   0x5   :  { %s869_s17 = smov 0   ;;  %s871_s18 = smov 0  }
   0x6 LB: > { %s886_s19 = sadd.s32 4294967295, %s830_s18   ;;  %s548_s20 = sadd.s32 4294967294, %s830_s18   ;;  %s830_s18 = sphi %s871_s18, %s1113_s18   ;;  %s826_s17 = sphi %s869_s17, %s1112_s17   ;;  %s822_s16 = sphi %s867_s16, %s1111_s16   ;;  %s818_s15 = sphi %s865_s15, %s1110_s15  }
   0x7   : > { %p41_p0 = scmp.ne.s32.totalorder %s822_s16, %s818_s15  ;;  %p1094_p1 = scmp.eq.s32.totalorder %s886_s19, 0 }
   0x8   : > { %p134_p3 = scmp.eq.s32.totalorder %s548_s20, 1  ;;  %p549_p5 = scmp.ge.s32.totalorder %s830_s18, 1 }
   0x9   : > { %p895_p4 = por %p1094_p1, %p41_p0  ;;  %p141_p7 = scmp.lt.s32.totalorder %s830_s18, 3 }
   0xa   : > { %p900_p6 = por %p134_p3, %p41_p0  ;;  %s832_s24 = smov [#allocation5]  }
   0xb   : > { %s1097_s21 = scalar_select %p895_p4, 1, 0 }
   0xc   : > { %s1098_s22 = scalar_select %p900_p6, 1, 0 }
   0xd   : > { %p905_p8 = pnand %p549_p5, %p141_p7  ;;  %s159_s25 = sshll.u32 %s832_s24, 4  ;;  %s909_s25 = int_to_ptr.vmem [resolvable:$true] %s159_s25 }
   0xe   : > { %s921_s27 = sadd.s32 1, %s830_s18   ;;  %s28_s28 = sadd.s32 1, %s826_s17 }
   0xf   : > { %s1099_s23 = scalar_select %p905_p8, 1, 0 }
  0x10   : > { %p640_p9 = pneg %p905_p8  ;;  %s25_s29 = ssub.s32 %s830_s18, %s921_s27 }
  0x11   : > { %s702_s6 = scalar_lea.hbm %s1092_s3, 1024 }
  0x12   : > { %p916_p11 = pnand %p640_p9, %p1094_p1  ;;  %p703_p12 = scmp.ne.s32.totalorder %s1092_s3, %s702_s6 }
  0x13   : > { %p709_p5 = scmp.lt.u32.totalorder %s702_s6, %s1092_s3 }
  0x14   : > { %p704_p13 = pneg %p916_p11 }
  0x16   : > { %p705_p0 = pnand %p704_p13, %p703_p12 }
  0x18   : > { %p706_p3 = pneg %p705_p0 }
  0x1a   : > { %p711_p7 = pnand %p709_p5, %p706_p3 }
  0x1c   : > { %714 = shalt.err (!%p711_p7)
}
  0x1d   : > { %s715_s11 = scalar_lea.vmem %s909_s25, 1024  ;;  %p723_p2 = scmp.lt.s32.totalorder %s909_s25, %s909_s25 }
  0x1e   : > { %p716_p9 = scmp.ne.s32.totalorder %s909_s25, %s715_s11  ;;  %p724_p6 = scmp.lt.s32.totalorder %s715_s11, %s715_s11 }
  0x20   : > { %p718_p10 = pnand %p716_p9, %p704_p13  ;;  %p725_p4 = por %p724_p6, %p723_p2 }
  0x22   : > { %p719_p1 = pneg %p718_p10 }
  0x24   : > { %p726_p8 = pnand %p725_p4, %p719_p1 }
  0x26   : > { %729 = shalt.err (!%p726_p8)
}
  0x27   : > { %s833_s12 = smov 64   ;;  %s834_s13 = smov 4  }
  0x28   : > { %643 = dma.hbm_to_vmem [thread:$0]  (!%p916_p11), %s1092_s3, 1024, %s909_s25, [#allocation6], %s833_s12, %s833_s12, %s834_s13  }
  0x29   : > { %p26_p1 = scmp.eq.s32.totalorder %s25_s29, 0  ;;  %p35_p2 = scmp.ne.s32.totalorder %s826_s17, %s822_s16 }
  0x2a   : > { %p36_p4 = scmp.eq.s32.totalorder %s830_s18, 0  ;;  %p653_p6 = scmp.lt.s32.totalorder %s830_s18, 2 }
  0x2b   : > { %s955_s24 = scalar_select %p26_p1, %s826_s17, %s28_s28  }
  0x2c   : > { %p37_p8 = por %p36_p4, %p35_p2  ;;  %p1101_p10 = scmp.eq.s32.totalorder %s886_s19, 1 }
  0x2d   : > { %s173_s26 = sand.u32 1, %s826_s17   ;;  %s578_s5 = sshll.u32 %s830_s18, 9 }
  0x2e   : > { %p959_p12 = por %p1101_p10, %p35_p2  ;;  %s552_s6 = sshll.u32 %s173_s26, 5 }
  0x2f   : > { %s968_s9 = scalar_lea.hbm %s1089_s0, %s578_s5  ;;  %s177_s25 = scalar_lea.vmem [#allocation2], %s552_s6 }
  0x30   : > { %s184_s28 = sshll.u32 %s177_s25, 4  ;;  %p970_p11 = pnand %p653_p6, %p37_p8  ;;  %s974_s28 = int_to_ptr.vmem [resolvable:$true] %s184_s28 }
  0x31   : > { %s976_s10 = scalar_lea.sflag [#allocation3], %s173_s26  ;;  %s730_s11 = scalar_lea.hbm %s968_s9, 512 }
  0x32   : > { %p731_p13 = scmp.ne.s32.totalorder %s968_s9, %s730_s11  ;;  %p732_p0 = pneg %p970_p11 }
  0x33   : > { %s735_s5 = scalar_lea.hbm %s1089_s0, 1024  ;;  %p736_p7 = scmp.lt.u32.totalorder %s968_s9, %s1089_s0 }
  0x34   : > { %p733_p3 = pnand %p732_p0, %p731_p13  ;;  %p737_p9 = scmp.lt.u32.totalorder %s735_s5, %s730_s11 }
  0x35   : > { %p739_p2 = scmp.lt.u32.totalorder %s730_s11, %s968_s9 }
  0x36   : > { %p734_p5 = pneg %p733_p3  ;;  %p738_p1 = por %p737_p9, %p736_p7 }
  0x38   : > { %p740_p4 = por %p739_p2, %p738_p1 }
  0x3a   : > { %p741_p6 = pnand %p740_p4, %p734_p5 }
  0x3c   : > { %744 = shalt.err (!%p741_p6)
}
  0x3d   : > { %s745_s26 = scalar_lea.vmem %s974_s28, 512  ;;  %s835_s8 = smov [#allocation2]  }
  0x3e   : > { %p746_p8 = scmp.ne.s32.totalorder %s974_s28, %s745_s26  ;;  %s750_s25 = sshll.u32 %s835_s8, 4  ;;  %s751_s25 = int_to_ptr.vmem [resolvable:$false] %s750_s25 }
  0x3f   : > { %s752_s14 = scalar_lea.vmem %s751_s25, 1024  ;;  %p753_p3 = scmp.lt.s32.totalorder %s974_s28, %s751_s25 }
  0x40   : > { %p748_p10 = pnand %p746_p8, %p732_p0  ;;  %p754_p7 = scmp.lt.s32.totalorder %s752_s14, %s745_s26 }
  0x42   : > { %p749_p13 = pneg %p748_p10  ;;  %p755_p9 = por %p754_p7, %p753_p3 }
  0x44   : > { %p756_p1 = pnand %p755_p9, %p749_p13 }
  0x46   : > { %759 = shalt.err (!%p756_p1)
}
  0x47   : > { %647 = dma.hbm_to_vmem [thread:$0]  (!%p970_p11), %s968_s9, 512, %s974_s28, %s976_s10, %s833_s12, %s833_s12, %s834_s13  }
  0x48   : > { %p1104_p0 = scmp.ne.s32.totalorder %s1099_s23, 0 }
  0x49   : > { %s1010_s11 = sand.u32 (!%p1104_p0), 1, %s822_s16   ;;  %p1105_p5 = scmp.ne.s32.totalorder (!%p1104_p0), %s1097_s21, 0 }
  0x4a   : > { %196 = sbr.rel (%p1104_p0) target bundleno = 348 (0x15c), region = 36  ;;  %s556_s20 = sshll.u32 (!%p1104_p0), %s1010_s11, 5 }
  0x4b   : > { %s199_s5 = scalar_lea.sflag (!%p1104_p0), [#allocation3], %s1010_s11  ;;  %s1014_s6 = scalar_lea.vmem (!%p1104_p0), [#allocation2], %s556_s20 }
  0x51   : > { %805 = dma.done.wait (%p1105_p5), %s199_s5, 512  }
  0x52   : > { %807 = vsyncadd (%p1105_p5), %s199_s5, 4294966784  ;;  %p1106_p11 = scmp.eq.s32.totalorder %s886_s19, 0 }
  0x54   : > { %809 = dma.done.wait (%p1106_p11), [#allocation6], 1024   ;;  %p1107_p2 = pmov %p1106_p11 }
  0x55   : > { %v246_v0 = vlaneseq  ;;  %v694_v1 = vld [vmem:[#allocation5] sm:$0xff]   ;;  %v695_v2 = vld [vmem:[#allocation5 + $0x8] sm:$0xff]   ;;  %v696_v4 = vld [vmem:[#allocation5 + $0x10] sm:$0xff]   ;;  %v836_v37 = vmov 0   ;;  %s558_s9 = sshll.u32 %s1010_s11, 6  ;;  %s579_s10 = sshll.u32 %s886_s19, 10 }
  0x56   : > { %811 = vsyncadd (%p1107_p2), [#allocation6], 4294966272  ;;  %592 = vmatprep.subr.bf16.mxu0 %v694_v1  ;;  %616 = vmatprep.subr.bf16.mxu1 %v694_v1  ;;  %v697_v6 = vld [vmem:[#allocation5 + $0x18] sm:$0xff]   ;;  %v242_v7 = vld [vmem:[%s1090_s1] sm:$0x1]  ;;  %s230_s28 = scalar_lea.vmem [#allocation7], %s558_s9  ;;  %s1045_s8 = scalar_lea.hbm %s1093_s4, %s579_s10 }
  0x57   : > { %593 = vmatpush3.bf16.msra.mxu0 %v694_v1  ;;  %624 = vmatpush3.bf16.msra.mxu1 %v694_v1  ;;  %v247_v3 = vshrl.u32 %v246_v0, 7  ;;  %v244_v8 = vpack.i.b16 %v242_v7, %v242_v7  ;;  %v262_v9 = vld [vmem:[%s1091_s2] sm:$0x1]  ;;  %v235_v14 = vld [vmem:[%s1014_s6 + $0x4] sm:$0xf]  ;;  %v699_v27 = vld [vmem:[#allocation5 + $0x28] sm:$0xff]  }
  0x58   : > { %594 = vmatprep.subr.bf16.mxu0 %v695_v2  ;;  %617 = vmatprep.subr.bf16.mxu1 %v695_v2  ;;  %v264_v10 = vpack.i.b16 %v262_v9, %v262_v9  ;;  %v698_v11 = vld [vmem:[#allocation5 + $0x20] sm:$0xff]   ;;  %v238_v16 = vld [vmem:[%s1014_s6 + $0x10] sm:$0xf]  ;;  %v239_v18 = vld [vmem:[%s1014_s6 + $0x14] sm:$0xf]  ;;  %s465_s29 = sshll.u32 %s230_s28, 4  ;;  %s1040_s29 = int_to_ptr.vmem [resolvable:$true] %s465_s29 }
  0x59   : > { %v248_v5 = vsub.s32 0, %v247_v3  ;;  %v234_v13 = vld [vmem:[%s1014_s6] sm:$0xf]  ;;  %v236_v20 = vld [vmem:[%s1014_s6 + $0x8] sm:$0xf]  ;;  %v700_v41 = vld [vmem:[#allocation5 + $0x30] sm:$0xff]  }
  0x5a   : > { %v237_v24 = vld [vmem:[%s1014_s6 + $0xc] sm:$0xf]  ;;  %v240_v25 = vld [vmem:[%s1014_s6 + $0x18] sm:$0xf]  ;;  %v241_v26 = vld [vmem:[%s1014_s6 + $0x1c] sm:$0xf] }
  0x5b   : > { %595 = vmatpush3.bf16.msra.mxu0 %v695_v2  ;;  %625 = vmatpush3.bf16.msra.mxu1 %v695_v2  ;;  %v249_v12 = vrot.slane %v244_v8, %v248_v5  ;;  %v269_v15 = vrot.slane %v264_v10, %v248_v5  ;;  %v701_v49 = vld [vmem:[#allocation5 + $0x38] sm:$0xff]   ;;  %s452_s19 = scalar_lea.sflag [#allocation4], %s1010_s11  ;;  %s760_s25 = scalar_lea.vmem %s1040_s29, 1024 }
  0x5c   : > { %596 = vmatprep.subr.bf16.mxu0 %v696_v4  ;;  %618 = vmatprep.subr.bf16.mxu1 %v696_v4  ;;  %p761_p4 = scmp.ne.s32.totalorder %s1040_s29, %s760_s25  ;;  %s837_s14 = smov [#allocation7]  }
  0x5d   : > { %v559_v17 = vcombine.low %v249_v12, %v249_v12  ;;  %v560_v19 = vcombine.low %v269_v15, %v269_v15  ;;  %s764_s20 = sshll.u32 %s837_s14, 4  ;;  %s765_s20 = int_to_ptr.vmem [resolvable:$false] %s764_s20 }
  0x5e   : > { %p762_p6 = pnand %p761_p4, %p959_p12  ;;  %s766_s5 = scalar_lea.vmem %s765_s20, 2048 }
  0x5f   : > { %597 = vmatpush3.bf16.msra.mxu0 %v696_v4  ;;  %626 = vmatpush3.bf16.msra.mxu1 %v696_v4  ;;  %v254_v21 = vmul.bf16 %v559_v17, %v234_v13  ;;  %v255_v22 = vmul.bf16 %v559_v17, %v235_v14  ;;  %v258_v23 = vmul.bf16 %v559_v17, %v238_v16  ;;  %p767_p10 = scmp.lt.s32.totalorder %s1040_s29, %s765_s20  ;;  %p768_p13 = scmp.lt.s32.totalorder %s766_s5, %s760_s25 }
  0x60   : > { %598 = vmatprep.subr.bf16.mxu0 %v697_v6  ;;  %619 = vmatprep.subr.bf16.mxu1 %v697_v6  ;;  %v259_v28 = vmul.bf16 %v559_v17, %v239_v18  ;;  %v256_v32 = vmul.bf16 %v559_v17, %v236_v20  ;;  %v257_v34 = vmul.bf16 %v559_v17, %v237_v24  ;;  %p763_p8 = pneg %p762_p6 }
  0x61   : > { %v274_v29 = vadd.bf16 %v560_v19, %v254_v21  ;;  %v275_v30 = vadd.bf16 %v560_v19, %v255_v22  ;;  %v278_v31 = vadd.bf16 %v560_v19, %v258_v23  ;;  %v260_v35 = vmul.bf16 %v559_v17, %v240_v25  ;;  %p769_p3 = por %p768_p13, %p767_p10 }
  0x62   : > { %v279_v33 = vadd.bf16 %v560_v19, %v259_v28  ;;  %v261_v36 = vmul.bf16 %v559_v17, %v241_v26  ;;  %v276_v44 = vadd.bf16 %v560_v19, %v256_v32  ;;  %v277_v46 = vadd.bf16 %v560_v19, %v257_v34 }
  0x63   : > { %599 = vmatpush3.bf16.msra.mxu0 %v697_v6  ;;  %627 = vmatpush3.bf16.msra.mxu1 %v697_v6  ;;  %v282_v38 = vmax.bf16 %v836_v37, %v274_v29  ;;  %v283_v39 = vmax.bf16 %v836_v37, %v275_v30  ;;  %v286_v40 = vmax.bf16 %v836_v37, %v278_v31  ;;  %p770_p7 = pnand %p769_p3, %p763_p8 }
  0x64   : > { %600 = vmatprep.subr.bf16.mxu0 %v698_v11  ;;  %620 = vmatprep.subr.bf16.mxu1 %v698_v11  ;;  %v287_v42 = vmax.bf16 %v836_v37, %v279_v33  ;;  %v280_v47 = vadd.bf16 %v560_v19, %v260_v35  ;;  %v281_v48 = vadd.bf16 %v560_v19, %v261_v36 }
  0x65   : > { %v561_v43 = vcombine.low %v282_v38, %v283_v39  ;;  %v284_v50 = vmax.bf16 %v836_v37, %v276_v44  ;;  %v285_v51 = vmax.bf16 %v836_v37, %v277_v46 }
  0x66   : > { %v563_v45 = vcombine.low %v286_v40, %v287_v42  ;;  %v288_v52 = vmax.bf16 %v836_v37, %v280_v47  ;;  %v289_v53 = vmax.bf16 %v836_v37, %v281_v48 }
  0x67   : > { %601 = vmatpush3.bf16.msra.mxu0 %v698_v11  ;;  %628 = vmatpush3.bf16.msra.mxu1 %v698_v11  ;;  %v562_v54 = vcombine.low %v284_v50, %v285_v51 }
  0x68   : > { %602 = vmatprep.subr.bf16.mxu0 %v699_v27  ;;  %621 = vmatprep.subr.bf16.mxu1 %v699_v27  ;;  %v564_v55 = vcombine.low %v288_v52, %v289_v53 }
  0x69   : > { %608 = vmatprep.mubr.bf16.mxu0 %v561_v43  ;;  %612 = vmatprep.mubr.bf16.mxu1 %v563_v45 }
  0x6b   : > { %603 = vmatpush3.bf16.msra.mxu0 %v699_v27  ;;  %629 = vmatpush3.bf16.msra.mxu1 %v699_v27 }
  0x6c   : > { %604 = vmatprep.subr.bf16.mxu0 %v700_v41  ;;  %622 = vmatprep.subr.bf16.mxu1 %v700_v41 }
  0x6f   : > { %605 = vmatpush3.bf16.msra.mxu0 %v700_v41  ;;  %630 = vmatpush3.bf16.msra.mxu1 %v700_v41 }
  0x70   : > { %606 = vmatprep.subr.bf16.mxu0 %v701_v49  ;;  %623 = vmatprep.subr.bf16.mxu1 %v701_v49 }
  0x73   : > { %607 = vmatpush3.bf16.msra.mxu0 %v701_v49  ;;  %631 = vmatpush3.bf16.msra.mxu1 %v701_v49 }
  0x76   : > { %609 = vmatmul.mubr.bf16.vlgmr.msra.gmra.mrb[0].mxu0 %v562_v54  ;;  %613 = vmatmul.mubr.bf16.vlgmr.msra.gmra.mrb[0].mxu1 %v564_v55 }
 0x149   : > { %v610_v56 = vpop.f32.mrb[0].mxu0  ;;  %v614_v57 = vpop.f32.mrb[0].mxu1 }
 0x14a   : > { %445 = vst [vmem:[%s230_s28 + $0x10] sm:$0xff] %v610_v56  ;;  %449 = vst [vmem:[%s230_s28 + $0x30] sm:$0xff] %v614_v57  ;;  %v412_v58 = vpop.f32.mrb[1].mxu0  ;;  %v428_v59 = vpop.f32.mrb[1].mxu1 }
 0x14b   : > { %443 = vst [vmem:[%s230_s28] sm:$0xff] %v412_v58  ;;  %447 = vst [vmem:[%s230_s28 + $0x20] sm:$0xff] %v428_v59  ;;  %v611_v60 = vpop.f32.mrb[2].mxu0  ;;  %v615_v61 = vpop.f32.mrb[2].mxu1 }
 0x14c   : > { %446 = vst [vmem:[%s230_s28 + $0x18] sm:$0xff] %v611_v60  ;;  %450 = vst [vmem:[%s230_s28 + $0x38] sm:$0xff] %v615_v61  ;;  %v415_v62 = vpop.f32.mrb[3].mxu0  ;;  %v431_v63 = vpop.f32.mrb[3].mxu1 }
 0x14d   : > { %444 = vst [vmem:[%s230_s28 + $0x8] sm:$0xff] %v415_v62  ;;  %448 = vst [vmem:[%s230_s28 + $0x28] sm:$0xff] %v431_v63 }
 0x14e   : > { %773 = shalt.err (!%p770_p7)
}
 0x14f   : > { %s774_s6 = scalar_lea.hbm %s1045_s8, 1024  ;;  %s778_s12 = scalar_lea.hbm %s1093_s4, 2048 }
 0x150   : > { %p775_p9 = scmp.ne.s32.totalorder %s1045_s8, %s774_s6  ;;  %p779_p5 = scmp.lt.u32.totalorder %s1045_s8, %s1093_s4 }
 0x151   : > { %p780_p11 = scmp.lt.u32.totalorder %s778_s12, %s774_s6  ;;  %p782_p4 = scmp.lt.u32.totalorder %s774_s6, %s1045_s8 }
 0x152   : > { %p776_p1 = pnand %p775_p9, %p959_p12 }
 0x153   : > { %p781_p2 = por %p780_p11, %p779_p5 }
 0x154   : > { %p777_p0 = pneg %p776_p1 }
 0x155   : > { %p783_p6 = por %p782_p4, %p781_p2 }
 0x157   : > { %p784_p8 = pnand %p783_p6, %p777_p0 }
 0x159   : > { %787 = shalt.err (!%p784_p8)
}
 0x15a   : > { %s838_s28 = smov 128   ;;  %s839_s10 = smov 8  }
 0x15b   : > { %638 = dma.vmem_to_hbm [thread:$0]  (%p959_p12), %s1040_s29, 1024, %s1045_s8, %s452_s19, %s838_s28, %s838_s28, %s839_s10  }
 0x15c PF: > { %s480_s7 = sand.u32 1, %s818_s15   ;;  %p1108_p10 = scmp.ne.s32.totalorder %s1098_s22, 0 }
 0x15d   : > { %p1109_p13 = scmp.ge.s32.totalorder %s830_s18, 2  ;;  %s481_s26 = scalar_lea.sflag [#allocation4], %s480_s7 }
 0x15f   : > { %p649_p3 = pnand %p1109_p13, %p1108_p10 }
 0x161   : > { %813 = dma.done.wait (!%p649_p3), %s481_s26, 1024  }
 0x162   : > { %815 = vsyncadd (!%p649_p3), %s481_s26, 4294966272  ;;  %p18_p7 = scmp.ge.s32.totalorder %s921_s27, 4   ;;  %s1110_s15 = smov %s822_s16 }
 0x163   : > { %s1111_s16 = smov %s826_s17  ;;  %s1112_s17 = smov %s955_s24 }
 0x164   : > { %s1113_s18 = smov %s921_s27  ;;  %20 = sbr.rel (!%p18_p7) target bundleno = 6 (0x6), region = 85 }
 0x16b   :  { %486 = vsyncpa [#allocation3], 1 }
 0x16c   :  { %488 = vsyncpa [#allocation3 + $0x1], 1 }
 0x16d   :  { %489 = vsyncpa [#allocation6], 1 }
 0x16e   :  { %490 = vsyncpa [#allocation4], 1 }
 0x16f   :  { %492 = vsyncpa [#allocation4 + $0x1], 1 }

</bundles_post_ra>
